<compile_context>
chip_gen: v5e
topology: v5e:2x2
jax: 0.10.0
libtpu: 0.0.40
codegen_flags: <defaults>
</compile_context>

<pallas_src>
import jax
import jax.numpy as jnp
from jax import lax
from jax.experimental import pallas as pl


# ---------------------------------------------------------------------------
# Kernels
# ---------------------------------------------------------------------------

def char_rnn_step_kernel(x_ref, h_ref, wxh_ref, whh_ref, wxo_ref, who_ref,
                         bh_ref, bo_ref, logp_ref, hnew_ref):
    """One RNN step (module forward). Split outputs, no concat/interior slice."""
    x = x_ref[...]
    h = h_ref[...]
    hnew = (jnp.dot(x, wxh_ref[...], preferred_element_type=jnp.float32)
            + jnp.dot(h, whh_ref[...], preferred_element_type=jnp.float32)
            + bh_ref[...])
    logits = (jnp.dot(x, wxo_ref[...], preferred_element_type=jnp.float32)
              + jnp.dot(h, who_ref[...], preferred_element_type=jnp.float32)
              + bo_ref[...])
    # Stable log-softmax; padded columns carry a -1e30 bias so exp() -> 0 and
    # they do not perturb max or the denominator.
    m = jnp.max(logits, axis=1, keepdims=True)
    s = logits - m
    logp_ref[...] = s - jnp.log(jnp.sum(jnp.exp(s), axis=1, keepdims=True))
    hnew_ref[...] = hnew


def char_rnn_seq_kernel(x_ref, h0_ref, wxh_ref, whh_ref, wxo_ref, who_ref,
                        bh_ref, bo_ref, logp_ref, hfinal_ref):
    """Whole sequence in one invocation: internal unrolled time loop."""
    T, B_pad, _ = x_ref.shape
    H = whh_ref.shape[0]
    O_pad = wxo_ref.shape[1]

    # Hoist loop-invariant loads and broadcasts out of the time loop.
    wxh = wxh_ref[...]
    whh = whh_ref[...]
    wxo = wxo_ref[...]
    who = who_ref[...]
    bh = jnp.broadcast_to(bh_ref[...], (B_pad, H))
    bo = jnp.broadcast_to(bo_ref[...], (B_pad, O_pad))

    def body(t, h):
        x_t = x_ref[t]                                   # (B_pad, I) VMEM load
        hnew = (jnp.dot(x_t, wxh, preferred_element_type=jnp.float32)
                + jnp.dot(h, whh, preferred_element_type=jnp.float32)
                + bh)
        logits = (jnp.dot(x_t, wxo, preferred_element_type=jnp.float32)
                  + jnp.dot(h, who, preferred_element_type=jnp.float32)
                  + bo)
        m = jnp.max(logits, axis=1, keepdims=True)
        s = logits - m
        logp_ref[t] = s - jnp.log(jnp.sum(jnp.exp(s), axis=1, keepdims=True))
        return hnew                                      # hidden carry (vregs)

    h_final = lax.fori_loop(0, T, body, h0_ref[...], unroll=True)
    hfinal_ref[...] = h_final                            # stored once, not per step


# ---------------------------------------------------------------------------
# Parameter prep (one-time, hoisted out of the step/sequence path)
# ---------------------------------------------------------------------------

def prepare_params(w_i2h, b_i2h, w_i2o, b_i2o, input_size, o_pad=128):
    """PyTorch layout w_* = (out_features, in_features=I+H).

    Returns wx_h (I,H), wh_h (H,H), wx_o (I,O_pad), wh_o (H,O_pad),
    b_h (1,H), b_o (1,O_pad); logits columns >= O get bias -1e30 so they
    vanish in the log-softmax while keeping the output lane-dense (128 wide).
    """
    H = w_i2h.shape[0]
    O = w_i2o.shape[0]
    o_pad = max(o_pad, ((O + 127) // 128) * 128)

    wx_h = w_i2h[:, :input_size].T.astype(jnp.float32)              # (I, H)
    wh_h = w_i2h[:, input_size:].T.astype(jnp.float32)              # (H, H)
    wx_o = jnp.zeros((input_size, o_pad), jnp.float32)
    wx_o = wx_o.at[:, :O].set(w_i2o[:, :input_size].T.astype(jnp.float32))
    wh_o = jnp.zeros((H, o_pad), jnp.float32)
    wh_o = wh_o.at[:, :O].set(w_i2o[:, input_size:].T.astype(jnp.float32))
    b_h = b_i2h.reshape(1, H).astype(jnp.float32)
    b_o = jnp.full((1, o_pad), -1e30, jnp.float32)
    b_o = b_o.at[0, :O].set(b_i2o.astype(jnp.float32))
    return wx_h, wh_h, wx_o, wh_o, b_h, b_o


def _pad_rows(a, rows):
    """Pad axis -2 (batch / sublane dim) up to `rows`."""
    if a.shape[-2] == rows:
        return a
    pad = [(0, 0)] * a.ndim
    pad[-2] = (0, rows - a.shape[-2])
    return jnp.pad(a, pad)


def _full_spec(shape):
    return pl.BlockSpec(shape, lambda: (0,) * len(shape))


# ---------------------------------------------------------------------------
# Wrappers
# ---------------------------------------------------------------------------

def char_rnn_step(x, h, params, output_size):
    """Single forward step (matches CharRNNClassify.forward). Returns (logp, h')."""
    wx_h, wh_h, wx_o, wh_o, b_h, b_o = params
    B, _ = x.shape
    H = wh_h.shape[0]
    O_pad = wx_o.shape[1]
    B_pad = max(8, ((B + 7) // 8) * 8)

    xp = _pad_rows(x.astype(jnp.float32), B_pad)
    hp = _pad_rows(h.astype(jnp.float32), B_pad)

    logp_pad, hnew_pad = pl.pallas_call(
        char_rnn_step_kernel,
        out_shape=(jax.ShapeDtypeStruct((B_pad, O_pad), jnp.float32),
                   jax.ShapeDtypeStruct((B_pad, H), jnp.float32)),
        in_specs=[_full_spec(xp.shape), _full_spec(hp.shape),
                  _full_spec(wx_h.shape), _full_spec(wh_h.shape),
                  _full_spec(wx_o.shape), _full_spec(wh_o.shape),
                  _full_spec(b_h.shape), _full_spec(b_o.shape)],
        out_specs=(_full_spec((B_pad, O_pad)), _full_spec((B_pad, H))),
    )(xp, hp, wx_h, wh_h, wx_o, wh_o, b_h, b_o)

    return logp_pad[:B, :output_size], hnew_pad[:B]


def char_rnn_sequence(x_seq, h0, params, output_size):
    """All T steps in ONE pallas_call. Returns (logp_seq (T,B,O), h_final (B,H))."""
    wx_h, wh_h, wx_o, wh_o, b_h, b_o = params
    T, B, _ = x_seq.shape
    H = wh_h.shape[0]
    O_pad = wx_o.shape[1]
    B_pad = max(8, ((B + 7) // 8) * 8)

    xs = _pad_rows(x_seq.astype(jnp.float32), B_pad)     # (T, B_pad, I)
    h0p = _pad_rows(h0.astype(jnp.float32), B_pad)       # (B_pad, H)

    logp_pad, h_final_pad = pl.pallas_call(
        char_rnn_seq_kernel,
        out_shape=(jax.ShapeDtypeStruct((T, B_pad, O_pad), jnp.float32),
                   jax.ShapeDtypeStruct((B_pad, H), jnp.float32)),
        in_specs=[_full_spec(xs.shape), _full_spec(h0p.shape),
                  _full_spec(wx_h.shape), _full_spec(wh_h.shape),
                  _full_spec(wx_o.shape), _full_spec(wh_o.shape),
                  _full_spec(b_h.shape), _full_spec(b_o.shape)],
        out_specs=(_full_spec((T, B_pad, O_pad)), _full_spec((B_pad, H))),
    )(xs, h0p, wx_h, wh_h, wx_o, wh_o, b_h, b_o)

    return logp_pad[:, :B, :output_size], h_final_pad[:B]


# ---------------------------------------------------------------------------
# Pure-JAX reference (mirrors the PyTorch module)
# ---------------------------------------------------------------------------

def reference_step(x, h, w_i2h, b_i2h, w_i2o, b_i2o):
    combined = jnp.concatenate([x, h], axis=1)
    hidden = combined @ w_i2h.T + b_i2h
    logits = combined @ w_i2o.T + b_i2o
    return jax.nn.log_softmax(logits, axis=1), hidden


if __name__ == "__main__":
    # Small shapes consistent with the module's forward:
    #   batch=2, input_size (n_letters)=32, hidden_size=32,
    #   output_size (n_categories)=16, sequence length T=8.
    B, I, H, O, T = 2, 32, 32, 16, 8

    key = jax.random.PRNGKey(0)
    ks = jax.random.split(key, 7)

    fan_in = I + H
    bound = 1.0 / (fan_in ** 0.5)
    w_i2h = jax.random.uniform(ks[0], (H, fan_in), jnp.float32, -bound, bound)
    b_i2h = jax.random.uniform(ks[1], (H,), jnp.float32, -bound, bound)
    w_i2o = jax.random.uniform(ks[2], (O, fan_in), jnp.float32, -bound, bound)
    b_i2o = jax.random.uniform(ks[3], (O,), jnp.float32, -bound, bound)

    x = jax.random.normal(ks[4], (B, I), dtype=jnp.float32)
    h = 0.1 * jax.random.normal(ks[5], (B, H), dtype=jnp.float32)
    x_seq = jax.random.normal(ks[6], (T, B, I), dtype=jnp.float32)

    # One-time parameter prep (transpose / split / lane-pad / bias mask).
    params = prepare_params(w_i2h, b_i2h, w_i2o, b_i2o, I)

    # ---- single step (module forward semantics) ----
    logp, hnew = char_rnn_step(x, h, params, O)
    jax.block_until_ready((logp, hnew))
    logp_ref, hnew_ref = reference_step(x, h, w_i2h, b_i2h, w_i2o, b_i2o)
    assert logp.shape == (B, O) and hnew.shape == (B, H)
    assert jnp.allclose(logp, logp_ref, atol=1e-4, rtol=1e-4)
    assert jnp.allclose(hnew, hnew_ref, atol=1e-4, rtol=1e-4)

    # ---- fused sequence: all T steps in a single pallas_call ----
    h0 = jnp.zeros((B, H), dtype=jnp.float32)            # init_hidden() analogue
    logp_seq, h_final = char_rnn_sequence(x_seq, h0, params, O)
    jax.block_until_ready((logp_seq, h_final))

    h_ref = h0
    ref_outs = []
    for t in range(T):
        o_t, h_ref = reference_step(x_seq[t], h_ref, w_i2h, b_i2h, w_i2o, b_i2o)
        ref_outs.append(o_t)
    logp_seq_ref = jnp.stack(ref_outs)
    assert logp_seq.shape == (T, B, O) and h_final.shape == (B, H)
    assert jnp.allclose(logp_seq, logp_seq_ref, atol=1e-4, rtol=1e-4)
    assert jnp.allclose(h_final, h_ref, atol=1e-4, rtol=1e-4)

    print("KERNEL_OK")
</pallas_src>

<mosaic_0001>
module attributes {stable_mosaic.version = 11 : i64} {
  func.func @char_rnn_step_kernel(%arg0: memref<8x32xf32, #tpu.memory_space<vmem>>, %arg1: memref<8x32xf32, #tpu.memory_space<vmem>>, %arg2: memref<32x32xf32, #tpu.memory_space<vmem>>, %arg3: memref<32x32xf32, #tpu.memory_space<vmem>>, %arg4: memref<32x128xf32, #tpu.memory_space<vmem>>, %arg5: memref<32x128xf32, #tpu.memory_space<vmem>>, %arg6: memref<1x32xf32, #tpu.memory_space<vmem>>, %arg7: memref<1x128xf32, #tpu.memory_space<vmem>>, %arg8: memref<8x128xf32, #tpu.memory_space<vmem>>, %arg9: memref<8x32xf32, #tpu.memory_space<vmem>>) attributes {dimension_semantics = [], scalar_prefetch = 0 : i64, scratch_operands = 0 : i64, tpu.core_type = #tpu.core_type<tc>} {
    %c0 = arith.constant 0 : index
    %c0_0 = arith.constant 0 : index
    %0 = vector.load %arg0[%c0, %c0_0] : memref<8x32xf32, #tpu.memory_space<vmem>>, vector<8x32xf32>
    %c0_1 = arith.constant 0 : index
    %c0_2 = arith.constant 0 : index
    %1 = vector.load %arg1[%c0_1, %c0_2] : memref<8x32xf32, #tpu.memory_space<vmem>>, vector<8x32xf32>
    %c0_3 = arith.constant 0 : index
    %c0_4 = arith.constant 0 : index
    %2 = vector.load %arg2[%c0_3, %c0_4] : memref<32x32xf32, #tpu.memory_space<vmem>>, vector<32x32xf32>
    %cst = arith.constant dense<0.000000e+00> : vector<8x32xf32>
    %3 = tpu.matmul %0, %2, %cst {dimension_numbers = #tpu.dot_dimension_numbers<[1], [0], [0], [1], [0, 0, 1, 1], [], []>} : vector<8x32xf32>, vector<32x32xf32>, vector<8x32xf32> -> vector<8x32xf32>
    %c0_5 = arith.constant 0 : index
    %c0_6 = arith.constant 0 : index
    %4 = vector.load %arg3[%c0_5, %c0_6] : memref<32x32xf32, #tpu.memory_space<vmem>>, vector<32x32xf32>
    %cst_7 = arith.constant dense<0.000000e+00> : vector<8x32xf32>
    %5 = tpu.matmul %1, %4, %cst_7 {dimension_numbers = #tpu.dot_dimension_numbers<[1], [0], [0], [1], [0, 0, 1, 1], [], []>} : vector<8x32xf32>, vector<32x32xf32>, vector<8x32xf32> -> vector<8x32xf32>
    %6 = arith.addf %3, %5 : vector<8x32xf32>
    %c0_8 = arith.constant 0 : index
    %c0_9 = arith.constant 0 : index
    %7 = vector.load %arg6[%c0_8, %c0_9] : memref<1x32xf32, #tpu.memory_space<vmem>>, vector<1x32xf32>
    %8 = vector.broadcast %7 : vector<1x32xf32> to vector<8x32xf32>
    %9 = arith.addf %6, %8 : vector<8x32xf32>
    %c0_10 = arith.constant 0 : index
    %c0_11 = arith.constant 0 : index
    %10 = vector.load %arg4[%c0_10, %c0_11] : memref<32x128xf32, #tpu.memory_space<vmem>>, vector<32x128xf32>
    %cst_12 = arith.constant dense<0.000000e+00> : vector<8x128xf32>
    %11 = tpu.matmul %0, %10, %cst_12 {dimension_numbers = #tpu.dot_dimension_numbers<[1], [0], [0], [1], [0, 0, 1, 1], [], []>} : vector<8x32xf32>, vector<32x128xf32>, vector<8x128xf32> -> vector<8x128xf32>
    %c0_13 = arith.constant 0 : index
    %c0_14 = arith.constant 0 : index
    %12 = vector.load %arg5[%c0_13, %c0_14] : memref<32x128xf32, #tpu.memory_space<vmem>>, vector<32x128xf32>
    %cst_15 = arith.constant dense<0.000000e+00> : vector<8x128xf32>
    %13 = tpu.matmul %1, %12, %cst_15 {dimension_numbers = #tpu.dot_dimension_numbers<[1], [0], [0], [1], [0, 0, 1, 1], [], []>} : vector<8x32xf32>, vector<32x128xf32>, vector<8x128xf32> -> vector<8x128xf32>
    %14 = arith.addf %11, %13 : vector<8x128xf32>
    %c0_16 = arith.constant 0 : index
    %c0_17 = arith.constant 0 : index
    %15 = vector.load %arg7[%c0_16, %c0_17] : memref<1x128xf32, #tpu.memory_space<vmem>>, vector<1x128xf32>
    %16 = vector.broadcast %15 : vector<1x128xf32> to vector<8x128xf32>
    %17 = arith.addf %14, %16 : vector<8x128xf32>
    %cst_18 = arith.constant dense<0xFF800000> : vector<8xf32>
    %18 = vector.multi_reduction <maximumf>, %17, %cst_18 [1] : vector<8x128xf32> to vector<8xf32>
    %19 = vector.shape_cast %18 : vector<8xf32> to vector<8x1xf32>
    %20 = vector.broadcast %19 : vector<8x1xf32> to vector<8x128xf32>
    %21 = arith.subf %17, %20 : vector<8x128xf32>
    %22 = math.exp %21 : vector<8x128xf32>
    %cst_19 = arith.constant dense<0.000000e+00> : vector<8xf32>
    %23 = vector.multi_reduction <add>, %22, %cst_19 [1] : vector<8x128xf32> to vector<8xf32>
    %24 = vector.shape_cast %23 : vector<8xf32> to vector<8x1xf32>
    %25 = math.log %24 : vector<8x1xf32>
    %26 = vector.broadcast %25 : vector<8x1xf32> to vector<8x128xf32>
    %27 = arith.subf %21, %26 : vector<8x128xf32>
    %c0_20 = arith.constant 0 : index
    %c0_21 = arith.constant 0 : index
    %28 = vector.load %arg8[%c0_20, %c0_21] : memref<8x128xf32, #tpu.memory_space<vmem>>, vector<8x128xf32>
    tpu.vector_store %arg8[%c0_20, %c0_21], %27 {strides = array<i32>} : memref<8x128xf32, #tpu.memory_space<vmem>>, vector<8x128xf32>,
    %c0_22 = arith.constant 0 : index
    %c0_23 = arith.constant 0 : index
    %29 = vector.load %arg9[%c0_22, %c0_23] : memref<8x32xf32, #tpu.memory_space<vmem>>, vector<8x32xf32>
    tpu.vector_store %arg9[%c0_22, %c0_23], %9 {strides = array<i32>} : memref<8x32xf32, #tpu.memory_space<vmem>>, vector<8x32xf32>,
    return
  }
}

</mosaic_0001>

<bundles_post_ra>
// kernel: tpu_custom_call.1
= control target key start
LH: loop header
LB: loop body
LE: loop exit
PB: predicated region body
PF: predicated region fallthrough
CT: control target
= control target key end

     0   :  { %15 = vsyncpa [#allocation3], 0  ;;  %s605_s0 = inlined_call_operand.hbm [shape: f32[8,32], index: 0, kind: input, shape index: {}]   ;;  %s606_s1 = inlined_call_operand.hbm [shape: f32[8,32], index: 1, kind: input, shape index: {}]   ;;  %s607_s2 = inlined_call_operand.hbm [shape: f32[32,32], index: 2, kind: input, shape index: {}]   ;;  %s608_s3 = inlined_call_operand.hbm [shape: f32[32,32], index: 3, kind: input, shape index: {}]   ;;  %s609_s4 = inlined_call_operand.hbm [shape: f32[32,128], index: 4, kind: input, shape index: {}]   ;;  %s610_s5 = inlined_call_operand.hbm [shape: f32[32,128], index: 5, kind: input, shape index: {}]   ;;  %s611_s6 = inlined_call_operand.vmem [shape: f32[1,32], index: 6, kind: input, shape index: {}]   ;;  %s612_s7 = inlined_call_operand.vmem [shape: f32[1,128], index: 7, kind: input, shape index: {}]   ;;  %s613_s8 = inlined_call_operand.hbm [shape: f32[8,128], index: 8, kind: output, shape index: {0}]   ;;  %s614_s9 = inlined_call_operand.hbm [shape: f32[8,32], index: 9, kind: output, shape index: {1}]  }
   0x1   :  { %16 = vsyncpa [#allocation6], 0 }
   0x2   :  { %17 = vsyncpa [#allocation9], 0 }
   0x3   :  { %18 = vsyncpa [#allocation12], 0 }
   0x4   :  { %19 = vsyncpa [#allocation4], 0  ;;  %s37_s11 = sshll.u32 %s606_s1, 4  ;;  %s38_s11 = int_to_ptr.hbm [resolvable:$true] %s37_s11 }
   0x5   :  { %20 = vsyncpa [#allocation15], 0  ;;  %s510_s12 = smov [#allocation5]   ;;  %s60_s16 = sshll.u32 %s608_s3, 4  ;;  %s61_s16 = int_to_ptr.hbm [resolvable:$true] %s60_s16 }
   0x6   :  { %s39_s13 = sshll.u32 %s510_s12, 4  ;;  %s511_s17 = smov [#allocation8]   ;;  %s40_s13 = int_to_ptr.vmem [resolvable:$true] %s39_s13 }
   0x7   :  { %42 = dma.hbm_to_vmem [thread:$0]  %s38_s11, 128, %s40_s13, [#allocation6]  }
   0x8   :  { %s62_s18 = sshll.u32 %s511_s17, 4  ;;  %s26_s21 = sshll.u32 %s605_s0, 4  ;;  %s63_s18 = int_to_ptr.vmem [resolvable:$true] %s62_s18  ;;  %s27_s21 = int_to_ptr.hbm [resolvable:$true] %s26_s21 }
   0x9   :  { %s512_s1 = smov 128   ;;  %s513_s22 = smov 8  }
   0xa   :  { %68 = dma.hbm_to_vmem [thread:$0]  %s61_s16, 512, %s63_s18, [#allocation9], %s512_s1, %s512_s1, %s513_s22  }
   0xb   :  { %s47_s25 = sshll.u32 %s607_s2, 4  ;;  %s514_s26 = smov [#allocation2]   ;;  %s48_s25 = int_to_ptr.hbm [resolvable:$true] %s47_s25 }
   0xc   :  { %s28_s27 = sshll.u32 %s514_s26, 4  ;;  %s515_s3 = smov [#allocation7]   ;;  %s29_s27 = int_to_ptr.vmem [resolvable:$true] %s28_s27 }
   0xd   :  { %31 = dma.hbm_to_vmem [thread:$0]  %s27_s21, 128, %s29_s27, [#allocation3]  }
   0xe   :  { %s49_s28 = sshll.u32 %s515_s3, 4  ;;  %s73_s0 = sshll.u32 %s609_s4, 4  ;;  %s50_s28 = int_to_ptr.vmem [resolvable:$true] %s49_s28  ;;  %s74_s0 = int_to_ptr.hbm [resolvable:$true] %s73_s0 }
   0xf   :  { %55 = dma.hbm_to_vmem [thread:$0]  %s48_s25, 512, %s50_s28, [#allocation6], %s512_s1, %s512_s1, %s513_s22  }
  0x10   :  { %s86_s12 = sshll.u32 %s610_s5, 4  ;;  %s516_s13 = smov [#allocation10]   ;;  %s87_s12 = int_to_ptr.hbm [resolvable:$true] %s86_s12 }
  0x11   :  { %s75_s2 = sshll.u32 %s516_s13, 4  ;;  %s517_s14 = smov [#allocation11]   ;;  %s76_s2 = int_to_ptr.vmem [resolvable:$true] %s75_s2 }
  0x12   :  { %81 = dma.hbm_to_vmem [thread:$0]  %s74_s0, 512, %s76_s2, [#allocation9], %s512_s1, %s512_s1, %s513_s22  }
  0x13   :  { %s88_s15 = sshll.u32 %s517_s14, 4  ;;  %s89_s15 = int_to_ptr.vmem [resolvable:$true] %s88_s15 }
  0x14   :  { %94 = dma.hbm_to_vmem [thread:$0]  %s87_s12, 512, %s89_s15, [#allocation12], %s512_s1, %s512_s1, %s513_s22  }
  0x15   :  { %498 = dma.done.wait [#allocation3], 128  }
  0x16   :  { %499 = vsyncadd [#allocation3], 4294967168 }
  0x17   :  { %500 = dma.done.wait [#allocation6], 640  }
  0x18   :  { %501 = vsyncadd [#allocation6], 4294966656 }
  0x19   :  { %502 = dma.done.wait [#allocation9], 1024  }
  0x1a   :  { %503 = vsyncadd [#allocation9], 4294966272 }
  0x1b   :  { %504 = dma.done.wait [#allocation12], 512  }
  0x1c   :  { %505 = vsyncadd [#allocation12], 4294966784  ;;  %v192_v0 = vld [vmem:[#allocation11 + $0x18] sm:$0xff]  ;;  %v191_v2 = vld [vmem:[#allocation11 + $0x10] sm:$0xff]  ;;  %vm133_vm0 = vcmask 261120   ;;  %s268_s19 = sshll.u32 %s614_s9, 4  ;;  %s269_s19 = int_to_ptr.hbm [resolvable:$true] %s268_s19 }
  0x1d   :  { %v188_v1 = vld [vmem:[#allocation10 + $0x18] sm:$0xff]  ;;  %205 = vmatpush.msra.mxu2 %v192_v0  ;;  %v187_v3 = vld [vmem:[#allocation10 + $0x10] sm:$0xff]  ;;  %v190_v4 = vld [vmem:[#allocation11 + $0x8] sm:$0xff]  ;;  %s519_s1 = smov [#allocation13]   ;;  %s257_s9 = sshll.u32 %s613_s8, 4  ;;  %s258_s9 = int_to_ptr.hbm [resolvable:$true] %s257_s9 }
  0x1e   :  { %225 = vmatpush.msra.mxu3 %v188_v1  ;;  %v186_v5 = vld [vmem:[#allocation10 + $0x8] sm:$0xff]  ;;  %v189_v6 = vld [vmem:[#allocation11] sm:$0xff]  ;;  %v124_v8 = vld [vmem:[#allocation5] sm:$0xff]  ;;  %s255_s22 = sshll.u32 %s519_s1, 4  ;;  %s256_s22 = int_to_ptr.vmem [resolvable:$true] %s255_s22 }
  0x1f   :  { %206 = vmatpush.msra.mxu2 %v191_v2  ;;  %v185_v7 = vld [vmem:[#allocation10] sm:$0xff]  ;;  %v123_v9 = vld [vmem:[#allocation2] sm:$0xff]  ;;  %v132_v15 = vld [vmem:[#allocation8 + $0x18] sm:$0xff] }
  0x20   :  { %226 = vmatpush.msra.mxu3 %v187_v3  ;;  %v300_v10 = vld [vmem:[%s612_s7] ss:$0 sm:$0xff]  ;;  %v128_v16 = vld [vmem:[#allocation7 + $0x18] sm:$0xff]  ;;  %149 = vmatpush.msra.mxu0 %v132_v15  ;;  %v130_v19 = vld [vmem:[#allocation8 + $0x8] sm:$0xff]  ;;  %s518_s7 = smov [#allocation14]  }
  0x21   :  { %207 = vmatpush.msra.mxu2 %v190_v4  ;;  %172 = vmatpush.msra.mxu1 %v128_v16  ;;  %v131_v17 = vld [vmem:[#allocation8 + $0x10] sm:$0xff]  ;;  %v126_v20 = vld [vmem:[#allocation7 + $0x8] sm:$0xff]  ;;  %v129_v21 = vld [vmem:[#allocation8] sm:$0xff]  ;;  %s266_s16 = sshll.u32 %s518_s7, 4  ;;  %s267_s16 = int_to_ptr.vmem [resolvable:$true] %s266_s16 }
  0x22   :  { %227 = vmatpush.msra.mxu3 %v186_v5  ;;  %v127_v18 = vld [vmem:[#allocation7 + $0x10] sm:$0xff]  ;;  %150 = vmatpush.msra.mxu0 %v131_v17  ;;  %v125_v22 = vld [vmem:[#allocation7] sm:$0xff] }
  0x23   :  { %208 = vmatpush.msra.mxu2 %v189_v6  ;;  %173 = vmatpush.msra.mxu1 %v127_v18  ;;  %v301_v30 = vld [vmem:[%s611_s6] ss:$0 sm:$0xff] }
  0x24   :  { %228 = vmatpush.msra.mxu3 %v185_v7  ;;  %288 = vmatmul.msk.f32.vlgmr.msra.gmra.mxu2 %vm133_vm0, %v124_v8 }
  0x25   :  { %289 = vmatmul.msk.f32.vlgmr.msra.gmra.mxu3 %vm133_vm0, %v123_v9  ;;  %151 = vmatpush.msra.mxu0 %v130_v19 }
  0x26   :  { %174 = vmatpush.msra.mxu1 %v126_v20 }
  0x27   :  { %152 = vmatpush.msra.mxu0 %v129_v21 }
  0x28   :  { %175 = vmatpush.msra.mxu1 %v125_v22  ;;  %286 = vmatmul.msk.f32.vlgmr.msra.gmra.mxu0 %vm133_vm0, %v124_v8 }
  0x29   :  { %287 = vmatmul.msk.f32.vlgmr.msra.gmra.mxu1 %vm133_vm0, %v123_v9 }
  0xa5   :  { %v154_v27 = vpop.f32.mrf.mxu0 }
  0xa6   :  { %v177_v28 = vpop.f32.mrf.mxu1 }
  0xa7   :  { %v210_v11 = vpop.f32.mrf.mxu2  ;;  %v178_v29 = vadd.f32 %v177_v28, %v154_v27 }
  0xa8   :  { %v230_v12 = vpop.f32.mrf.mxu3 }
  0xa9   :  { %v231_v13 = vadd.f32 %v230_v12, %v210_v11  ;;  %v184_v31 = vadd.f32 %v301_v30, %v178_v29 }
  0xab   :  { %v237_v14 = vadd.f32 %v300_v10, %v231_v13  ;;  %249 = vst.msk [vmem:[#allocation14] sm:$0xff] %vm133_vm0, %v184_v31 }
  0xac   :  { %271 = dma.vmem_to_hbm [thread:$0]  %s267_s16, 128, %s269_s19, [#allocation15]  }
  0xad   :  { %238 = vmax.xlane.f32.xlu0 %v237_v14 }
 0x120   :  { %v239_v23 = vpop.xlane.xlu0 %238 }
 0x121   :  { %v240_v24 = vsub.f32 %v237_v14, %v239_v23 }
 0x123   :  { %v241_v25 = vmul.f32 1.442695, %v240_v24 }
 0x125   :  { %302 = vpow2.f32 %v241_v25 }
 0x12b   :  { %v303_v26 = vpop.eup %302 }
 0x12c   :  { %243 = vadd.xlane.f32.xlu0 %v303_v26 }
 0x19f   :  { %v244_v32 = vpop.xlane.xlu0 %243 }
 0x1a0   :  { %304 = vlog2.f32 %v244_v32 }
 0x1a6   :  { %v305_v33 = vpop.eup %304 }
 0x1a7   :  { %v246_v34 = vmul.f32 0.6931472, %v305_v33 }
 0x1a9   :  { %v247_v35 = vsub.f32 %v240_v24, %v246_v34 }
 0x1ab   :  { %248 = vst [vmem:[#allocation13] sm:$0xff] %v247_v35 }
 0x1ac   :  { %260 = dma.vmem_to_hbm [thread:$0]  %s256_s22, 128, %s258_s9, [#allocation4]  }
 0x1ad   :  { %506 = dma.done.wait [#allocation4], 128  }
 0x1ae   :  { %507 = vsyncadd [#allocation4], 4294967168 }
 0x1af   :  { %508 = dma.done.wait [#allocation15], 128  }
 0x1b0   :  { %509 = vsyncadd [#allocation15], 4294967168 }
 0x1b1   :  { %280 = vsyncpa [#allocation3], 1 }
 0x1b2   :  { %281 = vsyncpa [#allocation6], 1 }
 0x1b3   :  { %282 = vsyncpa [#allocation9], 1 }
 0x1b4   :  { %283 = vsyncpa [#allocation12], 1 }
 0x1b5   :  { %284 = vsyncpa [#allocation4], 1 }
 0x1b6   :  { %285 = vsyncpa [#allocation15], 1 }

</bundles_post_ra>
